<compile_context>
chip_gen: v6e
topology: v6e:2x2x1
jax: 0.10.0
libtpu: 0.0.40
codegen_flags: <defaults>
</compile_context>

<pallas_src>
import functools

import jax
import jax.numpy as jnp
from jax.experimental import pallas as pl
from jax.experimental.pallas import tpu as pltpu

_MIB = 1024 * 1024


def _round_down(n, m):
    return (n // m) * m


def _vmem_capacity_bytes():
    cap = 64 * _MIB  # conservative fallback == v7x per-TC VMEM
    try:
        info = pltpu.get_tpu_info()
        c = int(getattr(info, "vmem_capacity_bytes", 0))
        if c > 0:
            cap = c
    except Exception:
        pass
    return max(cap, 64 * _MIB)


_VMEM_CAP = _vmem_capacity_bytes()
# v5e/v6e (128 MiB VMEM) -> 24 MiB blocks; v7x (64 MiB per TC) -> 16 MiB blocks.
_DEFAULT_BLOCK_BYTES = 24 * _MIB if _VMEM_CAP >= 100 * _MIB else 16 * _MIB


def _vmem_limit_bytes(block_bytes):
    # 2x double-buffered input block + output/scratch headroom, capped below
    # physical VMEM (v7x is the tight case: 2*16 MiB + 24 MiB = 56 MiB < 64 MiB).
    return int(min(2 * block_bytes + 24 * _MIB, _VMEM_CAP - 8 * _MIB))


def _all_kernel(x_ref, o_ref, *, k_axis, t_red, red):
    """AND-reduce over axis 1 of the block; reduction grid axis `k_axis` is last.

    Block layouts:
      last-axis path : x (t_rows, t_red)        -> o (t_rows, 1)
      mid-axis  path : x (t_pre, t_red, t_post) -> o (t_pre, 1, t_post)
    o_ref is the resident AND accumulator across the "arbitrary" K axis.
    """
    k = pl.program_id(k_axis)
    nk = pl.num_programs(k_axis)

    @pl.when(k == 0)
    def _init():
        o_ref[...] = jnp.ones_like(o_ref)

    def _update(mask_tail):
        zeros = x_ref[...] == 0  # True where element is falsy
        if mask_tail:
            # Only the padded tail of the last reduction chunk holds garbage.
            valid = red - k * t_red
            iota = jax.lax.broadcasted_iota(jnp.int32, zeros.shape, 1)
            zeros = zeros & (iota < valid)
        # int32 zero count along the reduction axis (robust lowering); the
        # block is "all nonzero" iff the count is 0.
        n_zero = jnp.sum(zeros.astype(jnp.int32), axis=1, keepdims=True)
        o_ref[...] = o_ref[...] & (n_zero == 0).astype(jnp.int8)

    if red % t_red != 0:
        # Keep the iota tail-mask out of the hot K loop: only the final step
        # carries padded data.
        @pl.when(k == nk - 1)
        def _tail():
            _update(True)

        @pl.when(k < nk - 1)
        def _body():
            _update(False)
    else:
        _update(False)


@functools.partial(jax.jit, static_argnums=(1,), static_argnames=("block_bytes",))
def all_net(x, axis, block_bytes=_DEFAULT_BLOCK_BYTES):
    """Equivalent of AllNet.forward(x, axis) == torch.all(x, dim=axis)."""
    ndim = x.ndim
    axis = axis % ndim
    shape = x.shape
    out_shape = shape[:axis] + shape[axis + 1:]

    red = shape[axis]
    pre = 1
    for d in shape[:axis]:
        pre *= d
    post = 1
    for d in shape[axis + 1:]:
        post *= d

    # Degenerate shapes: empty reduction axis => all True; empty output => empty.
    if red == 0 or pre * post == 0:
        return jnp.ones(out_shape, dtype=jnp.bool_)

    if x.dtype == jnp.bool_:
        # Reinterpret the bool bytes instead of astype (avoids a full extra
        # HBM read+write pass before the kernel).
        try:
            xb = jax.lax.bitcast_convert_type(x, jnp.uint8)
            x = xb if xb.shape == x.shape else x.astype(jnp.uint8)
        except Exception:
            x = x.astype(jnp.uint8)
    # TODO(synk): the torch module's CPU-only fp16->fp32 round-trip has no TPU
    # meaning; comparison against 0 is exact in every dtype, so it is skipped.
    dsize = jnp.dtype(x.dtype).itemsize

    vmem_limit = _vmem_limit_bytes(block_bytes)
    cost = pl.CostEstimate(flops=pre * red * post, transcendentals=0,
                           bytes_accessed=pre * red * post * dsize + pre * post)

    if post == 1:
        # ---- reduction over the contiguous last axis: lane reduction -----------
        x2d = x.reshape(pre, red)
        if red * 8 * dsize <= block_bytes:
            t_red = red  # contiguous full rows, single K step
        else:
            t_red = max(128, _round_down(block_bytes // (8 * dsize), 128))
        t_rows = min(pre, max(8, _round_down(block_bytes // (t_red * dsize), 8)))
        # Megacore: guarantee >= 2 parallel row-blocks whenever pre allows it.
        if pre > 8 and pl.cdiv(pre, t_rows) < 2:
            t_rows = max(8, _round_down(pre // 2, 8))
        grid = (pl.cdiv(pre, t_rows), pl.cdiv(red, t_red))

        kernel = functools.partial(_all_kernel, k_axis=1, t_red=t_red, red=red)
        out = pl.pallas_call(
            kernel,
            out_shape=jax.ShapeDtypeStruct((pre, 1), jnp.int8),
            grid_spec=pltpu.PrefetchScalarGridSpec(
                num_scalar_prefetch=0,
                grid=grid,
                in_specs=[pl.BlockSpec((t_rows, t_red), lambda i, k: (i, k))],
                out_specs=pl.BlockSpec((t_rows, 1), lambda i, k: (i, 0)),
            ),
            compiler_params=pltpu.CompilerParams(
                dimension_semantics=("parallel", "arbitrary"),
                vmem_limit_bytes=vmem_limit),
            cost_estimate=cost,
        )(x2d)
    else:
        # ---- non-last axis: no transpose, view as (pre, red, post) -------------
        x3d = x.reshape(pre, red, post)
        # Lanes first: take the full `post` whenever an 8-deep slab fits the
        # budget -> long contiguous DMA runs.
        if post * 8 * dsize <= block_bytes:
            t_post = post
        else:
            t_post = max(128, _round_down(block_bytes // (8 * dsize), 128))
        if red * t_post * dsize <= block_bytes:
            t_red = red
        else:
            t_red = max(8, _round_down(block_bytes // (t_post * dsize), 8))
        t_pre = min(pre, max(1, block_bytes // (t_red * t_post * dsize)))
        # Megacore: guarantee >= 2 parallel blocks.
        if pl.cdiv(pre, t_pre) * pl.cdiv(post, t_post) < 2:
            if pre > 1:
                t_pre = max(1, pre // 2)
            elif post >= 256 and t_post == post:
                t_post = max(128, _round_down(pl.cdiv(post, 2), 128))
        grid = (pl.cdiv(pre, t_pre), pl.cdiv(post, t_post), pl.cdiv(red, t_red))

        kernel = functools.partial(_all_kernel, k_axis=2, t_red=t_red, red=red)
        out = pl.pallas_call(
            kernel,
            out_shape=jax.ShapeDtypeStruct((pre, 1, post), jnp.int8),
            grid_spec=pltpu.PrefetchScalarGridSpec(
                num_scalar_prefetch=0,
                grid=grid,
                in_specs=[pl.BlockSpec((t_pre, t_red, t_post),
                                       lambda p, j, k: (p, k, j))],
                out_specs=pl.BlockSpec((t_pre, 1, t_post),
                                       lambda p, j, k: (p, 0, j)),
            ),
            compiler_params=pltpu.CompilerParams(
                dimension_semantics=("parallel", "parallel", "arbitrary"),
                vmem_limit_bytes=vmem_limit),
            cost_estimate=cost,
        )(x3d)

    return out.reshape(out_shape).astype(jnp.bool_)


if __name__ == "__main__":
    key = jax.random.PRNGKey(0)
    # Small NCHW-style input, consistent with a typical conv-net tensor.
    x = jax.random.normal(key, (2, 4, 16, 16), dtype=jnp.float32)
    # Plant zeros so the reduction is non-trivial.
    x = x.at[0, 1, 3, :].set(0.0)
    x = x.at[1, :, 5, 7].set(0.0)

    ok = True
    for ax in range(4):
        out = all_net(x, ax)
        jax.block_until_ready(out)
        ref = jnp.all(x != 0, axis=ax)
        ok = ok and out.shape == ref.shape and out.dtype == jnp.bool_
        ok = ok and bool(jnp.array_equal(out, ref))

    # Exercise the K-tiled reduction (pl.when-gated tail mask) with tiny blocks.
    k1, k2, k3 = jax.random.split(key, 3)
    y = jax.random.normal(k1, (4, 400, 8), dtype=jnp.float32)
    y = y.at[2, 17, 3].set(0.0)
    out_y = all_net(y, 1, block_bytes=4096)
    jax.block_until_ready(out_y)
    ok = ok and bool(jnp.array_equal(out_y, jnp.all(y != 0, axis=1)))

    z = jax.random.normal(k2, (16, 300), dtype=jnp.float32)
    z = z.at[5, 123].set(0.0)
    out_z = all_net(z, 1, block_bytes=4096)
    jax.block_until_ready(out_z)
    ok = ok and bool(jnp.array_equal(out_z, jnp.all(z != 0, axis=1)))

    # bool input path (bitcast instead of an extra HBM astype pass).
    b = jax.random.uniform(k3, (3, 5, 257)) > 0.05
    out_b = all_net(b, 2)
    jax.block_until_ready(out_b)
    ok = ok and bool(jnp.array_equal(out_b, jnp.all(b, axis=2)))

    assert ok
    print("KERNEL_OK")
</pallas_src>

<mosaic_0001>
module attributes {stable_mosaic.version = 11 : i64} {
  func.func @_all_kernel(%arg0: i32, %arg1: i32, %arg2: i32, %arg3: memref<1x2x512xf32, #tpu.memory_space<vmem>>, %arg4: memref<1x1x512xi8, #tpu.memory_space<vmem>>) attributes {dimension_semantics = [#tpu.dimension_semantics<parallel>, #tpu.dimension_semantics<parallel>, #tpu.dimension_semantics<arbitrary>], iteration_bounds = array<i64: 1, 2, 1>, scalar_prefetch = 0 : i64, scratch_operands = 0 : i64, tpu.core_type = #tpu.core_type<tc>, window_params = [{transform_indices = @transform_0, window_bounds = array<i64: 1, 2, 512>}, {transform_indices = @transform_1, window_bounds = array<i64: 1, 1, 512>}]} {
    %c0_i32 = arith.constant 0 : i32
    %0 = arith.cmpi eq, %arg2, %c0_i32 : i32
    %1 = arith.extui %0 : i1 to i32
    %c0_i32_0 = arith.constant 0 : i32
    %2 = arith.cmpi ne, %1, %c0_i32_0 : i32
    scf.if %2 {
      %c1_i8 = arith.constant 1 : i8
      %15 = vector.broadcast %c1_i8 : i8 to vector<1x1x512xi8>
      %c0_11 = arith.constant 0 : index
      %c0_12 = arith.constant 0 : index
      %c0_13 = arith.constant 0 : index
      %16 = vector.load %arg4[%c0_11, %c0_12, %c0_13] : memref<1x1x512xi8, #tpu.memory_space<vmem>>, vector<1x1x512xi8>
      tpu.vector_store %arg4[%c0_11, %c0_12, %c0_13], %15 {strides = array<i32>} : memref<1x1x512xi8, #tpu.memory_space<vmem>>, vector<1x1x512xi8>,
    } else {
    }
    %c0 = arith.constant 0 : index
    %c0_1 = arith.constant 0 : index
    %c0_2 = arith.constant 0 : index
    %3 = vector.load %arg3[%c0, %c0_1, %c0_2] : memref<1x2x512xf32, #tpu.memory_space<vmem>>, vector<1x2x512xf32>
    %cst = arith.constant 0.000000e+00 : f32
    %4 = vector.broadcast %cst : f32 to vector<1x2x512xf32>
    %5 = arith.cmpf oeq, %3, %4 : vector<1x2x512xf32>
    %6 = arith.extui %5 : vector<1x2x512xi1> to vector<1x2x512xi32>
    %cst_3 = arith.constant dense<0> : vector<1x512xi32>
    %7 = vector.multi_reduction <add>, %6, %cst_3 [1] : vector<1x2x512xi32> to vector<1x512xi32>
    %8 = vector.shape_cast %7 : vector<1x512xi32> to vector<1x1x512xi32>
    %c0_4 = arith.constant 0 : index
    %c0_5 = arith.constant 0 : index
    %c0_6 = arith.constant 0 : index
    %9 = vector.load %arg4[%c0_4, %c0_5, %c0_6] : memref<1x1x512xi8, #tpu.memory_space<vmem>>, vector<1x1x512xi8>
    %c0_i32_7 = arith.constant 0 : i32
    %10 = vector.broadcast %c0_i32_7 : i32 to vector<1x1x512xi32>
    %11 = arith.cmpi eq, %8, %10 : vector<1x1x512xi32>
    %12 = arith.extui %11 : vector<1x1x512xi1> to vector<1x1x512xi8>
    %13 = arith.andi %9, %12 : vector<1x1x512xi8>
    %c0_8 = arith.constant 0 : index
    %c0_9 = arith.constant 0 : index
    %c0_10 = arith.constant 0 : index
    %14 = vector.load %arg4[%c0_8, %c0_9, %c0_10] : memref<1x1x512xi8, #tpu.memory_space<vmem>>, vector<1x1x512xi8>
    tpu.vector_store %arg4[%c0_8, %c0_9, %c0_10], %13 {strides = array<i32>} : memref<1x1x512xi8, #tpu.memory_space<vmem>>, vector<1x1x512xi8>,
    return
  }
  func.func @transform_0(%arg0: i32, %arg1: i32, %arg2: i32) -> (i32, i32, i32) {
    %c0_i32 = arith.constant 0 : i32
    return %arg0, %arg2, %arg1 : i32, i32, i32
  }
  func.func @transform_1(%arg0: i32, %arg1: i32, %arg2: i32) -> (i32, i32, i32) {
    %c0_i32 = arith.constant 0 : i32
    %c0_i32_0 = arith.constant 0 : i32
    return %arg0, %c0_i32, %arg1 : i32, i32, i32
  }
}

</mosaic_0001>

<bundles_post_ra>
// kernel: all_net.1
= control target key start
LH: loop header
LB: loop body
LE: loop exit
PB: predicated region body
PF: predicated region fallthrough
CT: control target
= control target key end

     0   :  { %s487_s6 = smov 0   ;;  %s489_s7 = smov 0   ;;  %s568_s0 = inlined_call_operand.vmem [shape: f32[1,2,1024], index: 0, kind: input, shape index: {}]   ;;  %s569_s1 = inlined_call_operand.vmem [shape: s8[1,1,1024], index: 1, kind: output, shape index: {}]  }
   0x1   :  { %s491_s8 = smov 0  }
   0x2 LB: > { %s26_s9 = sadd.s32 1, %s468_s7  ;;  %p417_p0 = scmp.ge.s32.totalorder %s472_s8, 1  ;;  %s472_s8 = sphi %s491_s8, %s11_s8   ;;  %s468_s7 = sphi %s489_s7, %s577_s7   ;;  %s464_s6 = sphi %s487_s6, %s576_s6  }
   0x3   : > { %p28_p1 = scmp.ge.s32.totalorder %s26_s9, 2  ;;  %p121_p2 = scmp.lt.s32.totalorder %s472_s8, 3 }
   0x5   : > { %s579_s9 = smov (%p28_p1, %s26_s9), 0  ;;  %p122_p3 = pnand %p417_p0, %p121_p2 }
   0x6   : > { %s418_s10 = sshll.u32 (!%p122_p3), %s464_s6, 2 }
   0x7   : > { %125 = sbr.rel (%p122_p3) target bundleno = 60 (0x3c), region = 24  ;;  %p157_p4 = scmp.lt.s32.totalorder (!%p122_p3), %s418_s10, 7 }
   0xc   : > { %vm181_vm0 = vcmask 1040384   ;;  %vm182_vm1 = vsmask.f32 0  ;;  %vm184_vm2 = vcmask 1041409   ;;  %vm185_vm4 = vsmask.f32 1024 }
   0xd   : > { %vm505_vm3 = vmand %vm181_vm0, %vm182_vm1  ;;  %vm188_vm5 = vcmask 1042434   ;;  %vm189_vm6 = vsmask.f32 2048  ;;  %v206_v1 = vlaneseq  ;;  %s581_s10 = smov (!%p157_p4, %s418_s10), 7  ;;  %vm192_vm9 = vcmask 1043459  }
   0xe   : > { %vm186_vm7 = vmand %vm184_vm2, %vm185_vm4  ;;  %vm193_vm10 = vsmask.f32 3072  ;;  %v474_v2 = vmov 1983009808   ;;  %s419_s11 = sshll.u32 %s581_s10, 1  ;;  %s516_s14 = scalar_lea.vmem %s569_s1, %s581_s10  ;;  %v475_v12 = vmov 0  }
   0xf   : > { %vm187_vm8 = vmor %vm186_vm7, %vm505_vm3  ;;  %v204_v3 = vunpack.c.l.s4 %v474_v2  ;;  %v511_v4 = vshrl.u32 %v206_v1, 7  ;;  %s164_s17 = scalar_lea.vmem %s568_s0, %s419_s11  ;;  %v196_v8 = vld [vmem:[%s516_s14] sm:$0xf]  ;;  %vm219_vm0 = vcmask 1041408   ;;  %v476_v46 = vmov 1966171168  }
  0x10   : > { %vm190_vm11 = vmand %vm188_vm5, %vm189_vm6  ;;  %v199_v9 = vld [vmem:[%s164_s17] sm:$0xff]  ;;  %v284_v47 = vunpack.c.l.s4 %v476_v46 }
  0x11   : > { %vm518_vm12 = vmor %vm190_vm11, %vm187_vm8  ;;  %v205_v6 = vunpack.c.0.s8 %v204_v3  ;;  %vm200_vm15 = vcmp.eq.f32.partialorder %v199_v9, 0.0  ;;  %v259_v49 = vsub.s32 0, %v511_v4  ;;  %v263_v50 = vsub.s32 2, %v511_v4 }
  0x12   : > { %vm525_vm13 = vmand %vm192_vm9, %vm193_vm10  ;;  %v201_v13 = vsel %vm200_vm15, 1, %v475_v12  ;;  %v267_v51 = vsub.s32 4, %v511_v4  ;;  %v271_v52 = vsub.s32 6, %v511_v4  ;;  %v285_v53 = vunpack.c.0.s8 %v284_v47 }
  0x13   : > { %vm195_vm14 = vmor %vm525_vm13, %vm518_vm12  ;;  %v208_v10 = vsub.s32 %v205_v6, %v511_v4  ;;  %v202_v14 = vcombine.high %v201_v13, %v201_v13 }
  0x14   : > { %v197_v11 = vsel %vm195_vm14, 16843009, %v196_v8  ;;  %v288_v59 = vsub.s32 %v285_v53, %v511_v4 }
  0x15   : > { %198 = vst [vmem:[%s516_s14] sm:$0xf] %v197_v11  ;;  %v209_v15 = vrot.slane %v201_v13, %v208_v10  ;;  %v216_v16 = vrot.slane %v202_v14, %v208_v10 }
  0x17   : > { %v217_v17 = vcombine.high %v209_v15, %v209_v15  ;;  %v220_v18 = vsel %vm219_vm0, %v209_v15, 0  ;;  %v218_v20 = vcombine.high %v216_v16, %v216_v16  ;;  %v234_v22 = vsel %vm219_vm0, %v216_v16, 0 }
  0x18   : > { %v221_v19 = vrot.slane %v220_v18, 4  ;;  %v235_v25 = vrot.slane %v234_v22, 4 }
  0x19   : > { %v227_v21 = vsel %vm219_vm0, %v217_v17, 0  ;;  %v241_v26 = vsel %vm219_vm0, %v218_v20, 0 }
  0x1a   : > { %v222_v23 = vadd.s32 %v221_v19, %v220_v18  ;;  %v228_v24 = vrot.slane %v227_v21, 4  ;;  %v236_v29 = vadd.s32 %v235_v25, %v234_v22  ;;  %v242_v30 = vrot.slane %v241_v26, 4 }
  0x1c   : > { %v223_v27 = vrot.slane %v222_v23, 2  ;;  %v229_v28 = vadd.s32 %v228_v24, %v227_v21  ;;  %v237_v33 = vrot.slane %v236_v29, 2  ;;  %v243_v34 = vadd.s32 %v242_v30, %v241_v26  ;;  %v248_v8 = vld [vmem:[%s516_s14] sm:$0xf] }
  0x1e   : > { %v224_v31 = vadd.s32 %v223_v27, %v222_v23  ;;  %v230_v32 = vrot.slane %v229_v28, 2  ;;  %v238_v37 = vadd.s32 %v237_v33, %v236_v29  ;;  %v244_v38 = vrot.slane %v243_v34, 2 }
  0x20   : > { %v225_v35 = vrot.slane %v224_v31, 1  ;;  %v231_v36 = vadd.s32 %v230_v32, %v229_v28  ;;  %v239_v41 = vrot.slane %v238_v37, 1  ;;  %v245_v42 = vadd.s32 %v244_v38, %v243_v34 }
  0x22   : > { %v226_v39 = vadd.s32 %v225_v35, %v224_v31  ;;  %v232_v40 = vrot.slane %v231_v36, 1  ;;  %v240_v44 = vadd.s32 %v239_v41, %v238_v37  ;;  %v246_v45 = vrot.slane %v245_v42, 1 }
  0x24   : > { %v233_v43 = vadd.s32 %v232_v40, %v231_v36  ;;  %vm249_vm1 = vcmp.eq.s32.totalorder %v226_v39, 0  ;;  %v247_v48 = vadd.s32 %v246_v45, %v245_v42  ;;  %vm251_vm3 = vcmp.eq.s32.totalorder %v240_v44, 0 }
  0x26   : > { %vm250_vm2 = vcmp.eq.s32.totalorder %v233_v43, 0  ;;  %vm252_vm5 = vcmp.eq.s32.totalorder %v247_v48, 0 }
  0x27   : > { %vm253_vm4 = vmpackc.low %vm250_vm2, %vm249_vm1 }
  0x28   : > { %vm254_vm6 = vmpackc.low %vm252_vm5, %vm251_vm3 }
  0x29   : > { %vm255_vm7 = vmpackc.even %vm254_vm6, %vm253_vm4 }
  0x2a   : > { %v256_v54 = vsel %vm255_vm7, 16843009, %v475_v12 }
  0x2b   : > { %v260_v55 = vrot.slane %v256_v54, %v259_v49  ;;  %v264_v56 = vrot.slane %v256_v54, %v263_v50  ;;  %v268_v57 = vrot.slane %v256_v54, %v267_v51  ;;  %v272_v58 = vrot.slane %v256_v54, %v271_v52 }
  0x2d   : > { %vm273_vm8 = vnez %v260_v55  ;;  %vm274_vm9 = vnez %v264_v56  ;;  %vm275_vm10 = vnez %v268_v57  ;;  %vm276_vm11 = vnez %v272_v58 }
  0x2e   : > { %v277_v60 = vsel %vm273_vm8, 16843009, %v475_v12  ;;  %v278_v61 = vsel %vm274_vm9, 16843009, %v475_v12  ;;  %v279_v62 = vsel %vm275_vm10, 16843009, %v475_v12 }
  0x2f   : > { %v280_v63 = vsel %vm276_vm11, 16843009, %v475_v12  ;;  %v281_v0 = vcombine.low %v277_v60, %v278_v61 }
  0x30   : > { %v282_v1 = vcombine.low %v279_v62, %v280_v63 }
  0x31   : > { %v289_v2 = vrot.slane %v281_v0, %v288_v59 }
  0x32   : > { %v296_v3 = vrot.slane %v282_v1, %v288_v59 }
  0x34   : > { %v297_v6 = vcombine.low %v289_v2, %v296_v3 }
  0x36   : > { %v304_v4 = vrot.slane %v297_v6, %v288_v59 }
  0x38   : > { %v305_v9 = vand.u32 %v304_v4, %v248_v8 }
  0x3a   : > { %v321_v10 = vsel %vm195_vm14, %v305_v9, %v248_v8 }
  0x3b   : > { %322 = vst [vmem:[%s516_s14] sm:$0xf] %v321_v10 }
  0x3c PF: > { %s11_s8 = sadd.s32 1, %s472_s8   ;;  %s576_s6 = smov %s468_s7 }
  0x3d   : > { %p8_p5 = scmp.ge.s32.totalorder %s11_s8, 4   ;;  %s577_s7 = smov %s579_s9 }
  0x3f   :  { %10 = sbr.rel (!%p8_p5) target bundleno = 2 (0x2), region = 58 }

</bundles_post_ra>
